<compile_context>
chip_gen: v7x
topology: tpu7x:2x2x1
jax: 0.10.0
libtpu: 0.0.40
codegen_flags: <defaults>
</compile_context>

<pallas_src>
import jax
import jax.numpy as jnp
from jax.experimental import pallas as pl
from jax.experimental.pallas import tpu as pltpu

LEAKY_SLOPE = 0.01   # nn.LeakyReLU default negative_slope
BN_EPS = 1e-5        # nn.BatchNorm1d default eps

_FEATS = (64, 128, 64, 32)   # hidden widths of fc1..fc4


def _bias_leaky(z, bias_col):
    z = z + bias_col
    return jnp.maximum(z, LEAKY_SLOPE * z)   # single vmax instead of cmp+select


def binary_fcnn2_kernel(x_ref, w1_ref, w2_ref, w3_ref, w4_ref, p_ref, o_ref):
    """One batch tile.  Activations are (features, TB); batch lives in lanes.

    x_ref : (TB, in_features) f32 — raw input block, no wrapper transpose.
    w*_ref: bf16 BN-folded weights, (out_features, in_features).
    p_ref : (128, 8) f32 pack:
              col l (l=0..3) = folded bias of layer l+1
              col 4          = folded fc5 weight (32 rows, f32)
              col 5, row 0   = folded fc5 bias
    o_ref : (1, TB) f32 sigmoid outputs (lane-dense store).
    """
    xb = x_ref[...].astype(jnp.bfloat16)                      # (TB, in) bf16

    # fc1: contract the shared in_features dim of both operands ("trans-B"
    # matmul, same dimension_numbers as q @ k^T in flash attention) so the
    # result is already feature-major (64, TB) — no activation transpose and
    # no extra wrapper pass over x.
    z = jax.lax.dot_general(w1_ref[...], xb, (((1,), (1,)), ((), ())),
                            preferred_element_type=jnp.float32)
    h = _bias_leaky(z, p_ref[0:64, 0:1]).astype(jnp.bfloat16)

    z = jnp.dot(w2_ref[...], h, preferred_element_type=jnp.float32)   # (128, TB)
    h = _bias_leaky(z, p_ref[0:128, 1:2]).astype(jnp.bfloat16)

    z = jnp.dot(w3_ref[...], h, preferred_element_type=jnp.float32)   # (64, TB)
    h = _bias_leaky(z, p_ref[0:64, 2:3]).astype(jnp.bfloat16)

    z = jnp.dot(w4_ref[...], h, preferred_element_type=jnp.float32)   # (32, TB)
    h = _bias_leaky(z, p_ref[0:32, 3:4])                      # keep f32 for fc5

    # fc5 (M=1, K=32): VPU broadcast-mul + XLU 32-row reduce — the MXU would
    # waste an entire push/drain to produce a single sublane of result.
    w5 = p_ref[0:32, 4:5]                                     # (32, 1) f32
    logits = jnp.sum(h * w5, axis=0, keepdims=True) + p_ref[0:1, 5:6]
    o_ref[...] = jax.nn.sigmoid(logits)                       # (1, TB)
    # NOTE: if a v5e bundle dump shows vst slot_util is the binding slot at
    # TB>=512, sub-tile the lanes here with an unrolled lax.fori_loop over
    # 256-lane chunks (review item 8) — left out pending measurement.


def _round_up(n, m):
    return (n + m - 1) // m * m


def prepare_inference_params(params):
    """Fold eval-mode BatchNorm into the next layer and pack small vectors.

    Run ONCE per parameter set (params are static at inference) so the ~20
    tiny XLA ops it emits stay off the per-forward path.
    """
    scale, shift = {}, {}
    for i in range(1, 5):
        s = params[f"g{i}"] * jax.lax.rsqrt(params[f"v{i}"] + BN_EPS)
        scale[i] = s
        shift[i] = params[f"be{i}"] - params[f"m{i}"] * s

    # h_l = leaky(W_l a + b_l) * s_l + t_l  folds into layer l+1 as
    #   W'_{l+1} = W_{l+1} * s_l[None, :],   b'_{l+1} = b_{l+1} + W_{l+1} @ t_l
    w = {1: params["w1"]}
    b = {1: params["b1"]}
    for i in range(2, 6):
        w[i] = params[f"w{i}"] * scale[i - 1][None, :]
        b[i] = params[f"b{i}"] + params[f"w{i}"] @ shift[i - 1]

    weights = tuple(w[i].astype(jnp.bfloat16) for i in range(1, 5))

    pack = jnp.zeros((128, 8), jnp.float32)
    for i, f in enumerate(_FEATS, start=1):
        pack = pack.at[:f, i - 1].set(b[i])
    pack = pack.at[:32, 4].set(w[5][0])        # folded fc5 weight (kept f32)
    pack = pack.at[0, 5].set(b[5][0])          # folded fc5 bias
    return weights, pack


def binary_fcnn2_forward(x, weights, pack, *, block_b=2048):
    """x: (B, input_size) f32 -> (B, 1) f32 sigmoid probabilities."""
    B, in_features = x.shape
    if x.dtype != jnp.float32:
        x = x.astype(jnp.float32)

    # Batch tile (lanes): multiple of 128, capped by block_b, and capped so the
    # grid has >= 2 "parallel" steps whenever possible (v7x has 2 TCs/chip).
    tb = _round_up(min(block_b, max(B, 1)), 128)
    if B <= 2 * block_b:
        tb = min(tb, _round_up(pl.cdiv(B, 2), 128))
    tb = max(tb, 128)
    num_tiles = pl.cdiv(B, tb)
    b_pad = num_tiles * tb     # extra padded lanes are sliced off below

    in_specs = [pl.BlockSpec((tb, in_features), lambda i: (i, 0))]
    in_specs += [pl.BlockSpec(w.shape, lambda i: (0, 0)) for w in weights]
    in_specs += [pl.BlockSpec(pack.shape, lambda i: (0, 0))]
    out_spec = pl.BlockSpec((1, tb), lambda i: (0, i))

    out = pl.pallas_call(
        binary_fcnn2_kernel,
        out_shape=jax.ShapeDtypeStruct((1, b_pad), jnp.float32),
        grid_spec=pltpu.PrefetchScalarGridSpec(
            num_scalar_prefetch=0,
            grid=(num_tiles,),
            in_specs=in_specs,
            out_specs=out_spec,
        ),
        compiler_params=pltpu.CompilerParams(
            dimension_semantics=("parallel",),
        ),
    )(x, *weights, pack)

    return out[0, :B][:, None]


def init_params(key, input_size):
    """PyTorch-like init.  Weights stored (out_features, in_features)."""
    dims = [input_size, 64, 128, 64, 32, 1]
    params = {}
    for i in range(5):
        fan_in, fan_out = dims[i], dims[i + 1]
        key, kw, kb = jax.random.split(key, 3)
        bound = 1.0 / jnp.sqrt(float(fan_in))
        params[f"w{i + 1}"] = jax.random.uniform(
            kw, (fan_out, fan_in), jnp.float32, -bound, bound)
        params[f"b{i + 1}"] = jax.random.uniform(
            kb, (fan_out,), jnp.float32, -bound, bound)
    # Non-trivial BatchNorm running stats so the folding is actually exercised.
    for i, f in enumerate(_FEATS, start=1):
        key, kg, kb2, km, kv = jax.random.split(key, 5)
        params[f"g{i}"] = jax.random.uniform(kg, (f,), jnp.float32, 0.5, 1.5)
        params[f"be{i}"] = 0.1 * jax.random.normal(kb2, (f,), jnp.float32)
        params[f"m{i}"] = 0.1 * jax.random.normal(km, (f,), jnp.float32)
        params[f"v{i}"] = jax.random.uniform(kv, (f,), jnp.float32, 0.5, 1.5)
    return params


def reference_forward(x, p):
    """Pure-JAX f32 reference (eval-mode BinaryFCNN2 semantics)."""
    h = x
    for i in range(1, 5):
        z = h @ p[f"w{i}"].T + p[f"b{i}"]
        z = jnp.where(z >= 0, z, LEAKY_SLOPE * z)
        h = (z - p[f"m{i}"]) * jax.lax.rsqrt(p[f"v{i}"] + BN_EPS) * p[f"g{i}"] + p[f"be{i}"]
    return jax.nn.sigmoid(h @ p["w5"].T + p["b5"])


if __name__ == "__main__":
    key = jax.random.PRNGKey(0)
    key, kx, kp = jax.random.split(key, 3)

    batch = 200          # non-multiple of 128: exercises partial block + 2 grid steps
    input_size = 16
    x = jax.random.normal(kx, (batch, input_size), jnp.float32)
    params = init_params(kp, input_size)

    # Hoisted, one-time param prep (BN folding, bf16 casts, packing).
    weights, pack = prepare_inference_params(params)

    out = binary_fcnn2_forward(x, weights, pack)
    out = jax.block_until_ready(out)

    ref = reference_forward(x, params)
    assert out.shape == (batch, 1), out.shape
    # bf16 MXU inputs vs f32 reference: post-sigmoid diffs stay well under 2e-2.
    max_err = float(jnp.max(jnp.abs(out - ref)))
    assert max_err < 2e-2, max_err

    print("KERNEL_OK")
</pallas_src>

<mosaic_0001>
module attributes {stable_mosaic.version = 11 : i64} {
  func.func @binary_fcnn2_kernel(%arg0: i32, %arg1: memref<128x16xf32, #tpu.memory_space<vmem>>, %arg2: memref<64x16xbf16, #tpu.memory_space<vmem>>, %arg3: memref<128x64xbf16, #tpu.memory_space<vmem>>, %arg4: memref<64x128xbf16, #tpu.memory_space<vmem>>, %arg5: memref<32x64xbf16, #tpu.memory_space<vmem>>, %arg6: memref<128x8xf32, #tpu.memory_space<vmem>>, %arg7: memref<1x128xf32, #tpu.memory_space<vmem>>) attributes {dimension_semantics = [#tpu.dimension_semantics<parallel>], iteration_bounds = array<i64: 2>, scalar_prefetch = 0 : i64, scratch_operands = 0 : i64, tpu.core_type = #tpu.core_type<tc>, window_params = [{transform_indices = @transform_0, window_bounds = array<i64: 128, 16>}, {pipeline_mode = #tpu.pipeline_mode<synchronous>, transform_indices = @transform_1, window_bounds = array<i64: 64, 16>}, {pipeline_mode = #tpu.pipeline_mode<synchronous>, transform_indices = @transform_2, window_bounds = array<i64: 128, 64>}, {pipeline_mode = #tpu.pipeline_mode<synchronous>, transform_indices = @transform_3, window_bounds = array<i64: 64, 128>}, {pipeline_mode = #tpu.pipeline_mode<synchronous>, transform_indices = @transform_4, window_bounds = array<i64: 32, 64>}, {pipeline_mode = #tpu.pipeline_mode<synchronous>, transform_indices = @transform_5, window_bounds = array<i64: 128, 8>}, {transform_indices = @transform_6, window_bounds = array<i64: 1, 128>}]} {
    %c0 = arith.constant 0 : index
    %c0_0 = arith.constant 0 : index
    %0 = vector.load %arg1[%c0, %c0_0] : memref<128x16xf32, #tpu.memory_space<vmem>>, vector<128x16xf32>
    %1 = arith.truncf %0 : vector<128x16xf32> to vector<128x16xbf16>
    %c0_1 = arith.constant 0 : index
    %c0_2 = arith.constant 0 : index
    %2 = vector.load %arg2[%c0_1, %c0_2] : memref<64x16xbf16, #tpu.memory_space<vmem>>, vector<64x16xbf16>
    %cst = arith.constant dense<0.000000e+00> : vector<64x128xf32>
    %3 = tpu.matmul %2, %1, %cst {dimension_numbers = #tpu.dot_dimension_numbers<[1], [1], [0], [0], [0, 0, 1, 0], [], []>} : vector<64x16xbf16>, vector<128x16xbf16>, vector<64x128xf32> -> vector<64x128xf32>
    %c0_3 = arith.constant 0 : index
    %c0_4 = arith.constant 0 : index
    %4 = vector.load %arg6[%c0_3, %c0_4] : memref<128x8xf32, #tpu.memory_space<vmem>>, vector<64x1xf32>
    %5 = vector.broadcast %4 : vector<64x1xf32> to vector<64x128xf32>
    %6 = arith.addf %3, %5 : vector<64x128xf32>
    %cst_5 = arith.constant 0.00999999977 : f32
    %7 = vector.broadcast %cst_5 : f32 to vector<64x128xf32>
    %8 = arith.mulf %7, %6 : vector<64x128xf32>
    %9 = arith.maximumf %6, %8 : vector<64x128xf32>
    %10 = arith.truncf %9 : vector<64x128xf32> to vector<64x128xbf16>
    %c0_6 = arith.constant 0 : index
    %c0_7 = arith.constant 0 : index
    %11 = vector.load %arg3[%c0_6, %c0_7] : memref<128x64xbf16, #tpu.memory_space<vmem>>, vector<128x64xbf16>
    %cst_8 = arith.constant dense<0.000000e+00> : vector<128x128xf32>
    %12 = tpu.matmul %11, %10, %cst_8 {dimension_numbers = #tpu.dot_dimension_numbers<[1], [0], [0], [1], [0, 0, 1, 1], [], []>} : vector<128x64xbf16>, vector<64x128xbf16>, vector<128x128xf32> -> vector<128x128xf32>
    %c0_9 = arith.constant 0 : index
    %c1 = arith.constant 1 : index
    %13 = vector.load %arg6[%c0_9, %c1] : memref<128x8xf32, #tpu.memory_space<vmem>>, vector<128x1xf32>
    %14 = vector.broadcast %13 : vector<128x1xf32> to vector<128x128xf32>
    %15 = arith.addf %12, %14 : vector<128x128xf32>
    %cst_10 = arith.constant 0.00999999977 : f32
    %16 = vector.broadcast %cst_10 : f32 to vector<128x128xf32>
    %17 = arith.mulf %16, %15 : vector<128x128xf32>
    %18 = arith.maximumf %15, %17 : vector<128x128xf32>
    %19 = arith.truncf %18 : vector<128x128xf32> to vector<128x128xbf16>
    %c0_11 = arith.constant 0 : index
    %c0_12 = arith.constant 0 : index
    %20 = vector.load %arg4[%c0_11, %c0_12] : memref<64x128xbf16, #tpu.memory_space<vmem>>, vector<64x128xbf16>
    %cst_13 = arith.constant dense<0.000000e+00> : vector<64x128xf32>
    %21 = tpu.matmul %20, %19, %cst_13 {dimension_numbers = #tpu.dot_dimension_numbers<[1], [0], [0], [1], [0, 0, 1, 1], [], []>} : vector<64x128xbf16>, vector<128x128xbf16>, vector<64x128xf32> -> vector<64x128xf32>
    %c0_14 = arith.constant 0 : index
    %c2 = arith.constant 2 : index
    %22 = vector.load %arg6[%c0_14, %c2] : memref<128x8xf32, #tpu.memory_space<vmem>>, vector<64x1xf32>
    %23 = vector.broadcast %22 : vector<64x1xf32> to vector<64x128xf32>
    %24 = arith.addf %21, %23 : vector<64x128xf32>
    %cst_15 = arith.constant 0.00999999977 : f32
    %25 = vector.broadcast %cst_15 : f32 to vector<64x128xf32>
    %26 = arith.mulf %25, %24 : vector<64x128xf32>
    %27 = arith.maximumf %24, %26 : vector<64x128xf32>
    %28 = arith.truncf %27 : vector<64x128xf32> to vector<64x128xbf16>
    %c0_16 = arith.constant 0 : index
    %c0_17 = arith.constant 0 : index
    %29 = vector.load %arg5[%c0_16, %c0_17] : memref<32x64xbf16, #tpu.memory_space<vmem>>, vector<32x64xbf16>
    %cst_18 = arith.constant dense<0.000000e+00> : vector<32x128xf32>
    %30 = tpu.matmul %29, %28, %cst_18 {dimension_numbers = #tpu.dot_dimension_numbers<[1], [0], [0], [1], [0, 0, 1, 1], [], []>} : vector<32x64xbf16>, vector<64x128xbf16>, vector<32x128xf32> -> vector<32x128xf32>
    %c0_19 = arith.constant 0 : index
    %c3 = arith.constant 3 : index
    %31 = vector.load %arg6[%c0_19, %c3] : memref<128x8xf32, #tpu.memory_space<vmem>>, vector<32x1xf32>
    %32 = vector.broadcast %31 : vector<32x1xf32> to vector<32x128xf32>
    %33 = arith.addf %30, %32 : vector<32x128xf32>
    %cst_20 = arith.constant 0.00999999977 : f32
    %34 = vector.broadcast %cst_20 : f32 to vector<32x128xf32>
    %35 = arith.mulf %34, %33 : vector<32x128xf32>
    %36 = arith.maximumf %33, %35 : vector<32x128xf32>
    %c0_21 = arith.constant 0 : index
    %c4 = arith.constant 4 : index
    %37 = vector.load %arg6[%c0_21, %c4] : memref<128x8xf32, #tpu.memory_space<vmem>>, vector<32x1xf32>
    %38 = vector.broadcast %37 : vector<32x1xf32> to vector<32x128xf32>
    %39 = arith.mulf %36, %38 : vector<32x128xf32>
    %cst_22 = arith.constant dense<0.000000e+00> : vector<128xf32>
    %40 = vector.multi_reduction <add>, %39, %cst_22 [0] : vector<32x128xf32> to vector<128xf32>
    %41 = vector.shape_cast %40 : vector<128xf32> to vector<1x128xf32>
    %c0_23 = arith.constant 0 : index
    %c5 = arith.constant 5 : index
    %42 = vector.load %arg6[%c0_23, %c5] : memref<128x8xf32, #tpu.memory_space<vmem>>, vector<1x1xf32>
    %43 = vector.broadcast %42 : vector<1x1xf32> to vector<1x128xf32>
    %44 = arith.addf %41, %43 : vector<1x128xf32>
    %45 = arith.negf %44 : vector<1x128xf32>
    %46 = math.exp %45 : vector<1x128xf32>
    %cst_24 = arith.constant 1.000000e+00 : f32
    %47 = vector.broadcast %cst_24 : f32 to vector<1x128xf32>
    %48 = arith.addf %47, %46 : vector<1x128xf32>
    %49 = arith.divf %47, %48 : vector<1x128xf32>
    %c0_25 = arith.constant 0 : index
    %c0_26 = arith.constant 0 : index
    %50 = vector.load %arg7[%c0_25, %c0_26] : memref<1x128xf32, #tpu.memory_space<vmem>>, vector<1x128xf32>
    tpu.vector_store %arg7[%c0_25, %c0_26], %49 {strides = array<i32>} : memref<1x128xf32, #tpu.memory_space<vmem>>, vector<1x128xf32>,
    return
  }
  func.func @transform_0(%arg0: i32) -> (i32, i32) {
    %c0_i32 = arith.constant 0 : i32
    %c0_i32_0 = arith.constant 0 : i32
    return %arg0, %c0_i32 : i32, i32
  }
  func.func @transform_1(%arg0: i32) -> (i32, i32) {
    %c0_i32 = arith.constant 0 : i32
    %c0_i32_0 = arith.constant 0 : i32
    %c0_i32_1 = arith.constant 0 : i32
    return %c0_i32, %c0_i32_0 : i32, i32
  }
  func.func @transform_2(%arg0: i32) -> (i32, i32) {
    %c0_i32 = arith.constant 0 : i32
    %c0_i32_0 = arith.constant 0 : i32
    %c0_i32_1 = arith.constant 0 : i32
    return %c0_i32, %c0_i32_0 : i32, i32
  }
  func.func @transform_3(%arg0: i32) -> (i32, i32) {
    %c0_i32 = arith.constant 0 : i32
    %c0_i32_0 = arith.constant 0 : i32
    %c0_i32_1 = arith.constant 0 : i32
    return %c0_i32, %c0_i32_0 : i32, i32
  }
  func.func @transform_4(%arg0: i32) -> (i32, i32) {
    %c0_i32 = arith.constant 0 : i32
    %c0_i32_0 = arith.constant 0 : i32
    %c0_i32_1 = arith.constant 0 : i32
    return %c0_i32, %c0_i32_0 : i32, i32
  }
  func.func @transform_5(%arg0: i32) -> (i32, i32) {
    %c0_i32 = arith.constant 0 : i32
    %c0_i32_0 = arith.constant 0 : i32
    %c0_i32_1 = arith.constant 0 : i32
    return %c0_i32, %c0_i32_0 : i32, i32
  }
  func.func @transform_6(%arg0: i32) -> (i32, i32) {
    %c0_i32 = arith.constant 0 : i32
    %c0_i32_0 = arith.constant 0 : i32
    return %c0_i32, %arg0 : i32, i32
  }
}

</mosaic_0001>

<bundles_post_ra>
// kernel: tpu_custom_call.1
= control target key start
LH: loop header
LB: loop body
LE: loop exit
PB: predicated region body
PF: predicated region fallthrough
CT: control target
= control target key end

     0   :  { %11 = vsyncpa [#allocation3], 0  ;;  %s1829_s0 = inlined_call_operand.vmem [shape: f32[200,16], index: 0, kind: input, shape index: {}]   ;;  %s1830_s1 = inlined_call_operand.vmem [shape: bf16[64,16], index: 1, kind: input, shape index: {}]   ;;  %s1831_s2 = inlined_call_operand.vmem [shape: bf16[128,64], index: 2, kind: input, shape index: {}]   ;;  %s1832_s3 = inlined_call_operand.vmem [shape: bf16[64,128], index: 3, kind: input, shape index: {}]   ;;  %s1833_s4 = inlined_call_operand.vmem [shape: bf16[32,64], index: 4, kind: input, shape index: {}]   ;;  %s1834_s5 = inlined_call_operand.vmem [shape: f32[128,8], index: 5, kind: input, shape index: {}]   ;;  %s1835_s6 = inlined_call_operand.hbm [shape: f32[1,256], index: 6, kind: output, shape index: {}]  }
   0x1   :  { %13 = vsyncpa [#allocation3 + $0x1], 0  ;;  %s1529_s21 = smov 0   ;;  %s1531_s22 = smov 0  }
   0x2   :  { %s1533_s23 = smov 0   ;;  %s1535_s24 = smov 0  }
   0x3 LB: > { %s1168_s25 = sadd.s32 4294967295, %s1485_s24   ;;  %s1169_s26 = sadd.s32 4294967294, %s1485_s24   ;;  %s1485_s24 = sphi %s1535_s24, %s1841_s24   ;;  %s1481_s23 = sphi %s1533_s23, %s1840_s23   ;;  %s1477_s22 = sphi %s1531_s22, %s1839_s22   ;;  %s1473_s21 = sphi %s1529_s21, %s1838_s21  }
   0x4   : > { %s1552_s27 = sadd.s32 1, %s1485_s24   ;;  %s157_s28 = sadd.s32 1, %s1481_s23 }
   0x5   : > { %s154_s29 = ssub.s32 %s1485_s24, %s1552_s27  ;;  %p167_p0 = scmp.ne.s32.totalorder %s1481_s23, %s1477_s22 }
   0x6   : > { %p155_p1 = scmp.eq.s32.totalorder %s154_s29, 0  ;;  %p168_p2 = scmp.eq.s32.totalorder %s1168_s25, 1 }
   0x7   : > { %p173_p3 = scmp.ne.s32.totalorder %s1477_s22, %s1473_s21  ;;  %p174_p4 = scmp.eq.s32.totalorder %s1169_s26, 1 }
   0x8   : > { %s1562_s30 = scalar_select %p155_p1, %s1481_s23, %s157_s28  }
   0x9   : > { %p1564_p5 = por %p168_p2, %p167_p0  ;;  %p1568_p6 = por %p174_p4, %p173_p3 }
   0xa   : > { %p1172_p7 = scmp.ge.s32.totalorder %s1485_s24, 1  ;;  %p224_p8 = scmp.lt.s32.totalorder %s1485_s24, 3 }
   0xc   : > { %p225_p9 = pnand %p1172_p7, %p224_p8 }
   0xd   : > { %s1574_s9 = sshll.u32 (!%p225_p9), %s1168_s25, 4  ;;  %v1401_v0 = vld [vmem:[%s1830_s1] sm:$0xff] (!%p225_p9)   ;;  %vm372_vm0 = vcmask (!%p225_p9), 130048   ;;  %v1487_v1 = vmov (!%p225_p9), 0   ;;  %v1590_v3 = vld [vmem:[%s1834_s5 + $0x10] sm:$0xff] (!%p225_p9)  ;;  %v1602_v4 = vld [vmem:[%s1834_s5 + $0x8] sm:$0xff] (!%p225_p9) }
   0xe   : > { %228 = sbr.rel (%p225_p9) target bundleno = 1108 (0x454), region = 44  ;;  %p262_p10 = scmp.lt.s32.totalorder (!%p225_p9), %s1574_s9, 24  ;;  %1269 = vmatprep.mubr.msk.bf16.mxu0 (!%p225_p9), %vm372_vm0, %v1401_v0  ;;  %1390 = vset.pattern.permute.xlu0 (!%p225_p9), %v1487_v1  ;;  %v1585_v2 = vld [vmem:[%s1834_s5] sm:$0xff] (!%p225_p9)  ;;  %v1607_v5 = vld [vmem:[%s1834_s5 + $0x18] sm:$0xff] (!%p225_p9)  ;;  %v1625_v14 = vld [vmem:[%s1834_s5 + $0x28] sm:$0xff] (!%p225_p9)  ;;  %vm646_vm1 = vcmask (!%p225_p9), 523264  }
   0xf   : > { %1391 = vset.pattern.permute.xlu1 (!%p225_p9), %v1487_v1  ;;  %314 = vperm.xlu0 (!%p225_p9), %1390, %v1585_v2   ;;  %v1620_v13 = vld [vmem:[%s1834_s5 + $0x20] sm:$0xff] (!%p225_p9)  ;;  %v1632_v16 = vld [vmem:[%s1834_s5 + $0x30] sm:$0xff] (!%p225_p9)  ;;  %v1640_v18 = vld [vmem:[%s1834_s5 + $0x38] sm:$0xff] (!%p225_p9)  ;;  %v1488_v46 = vmov (!%p225_p9), 1   ;;  %s255_s10 = sand.u32 (!%p225_p9), 1, %s1477_s22   ;;  %s1787_s15 = scalar_lea.hbm (!%p225_p9), %s1835_s6, %s1574_s9 }
  0x10   : > { %324 = vperm.xlu1 (!%p225_p9), %1391, %v1590_v3   ;;  %v1402_v42 = vld [vmem:[%s1830_s1 + $0x8] sm:$0xff] (!%p225_p9)   ;;  %v1403_v43 = vld [vmem:[%s1830_s1 + $0x10] sm:$0xff] (!%p225_p9)   ;;  %v1404_v44 = vld [vmem:[%s1830_s1 + $0x18] sm:$0xff] (!%p225_p9)   ;;  %s256_s11 = scalar_lea.vmem (!%p225_p9), [#allocation2], %s255_s10  ;;  %s1102_s16 = scalar_lea.sflag (!%p225_p9), [#allocation3], %s255_s10 }
  0x11   : > { %v1405_v45 = vld [vmem:[%s1831_s2] sm:$0xff] (!%p225_p9)   ;;  %v519_v48 = vld [vmem:[%s1834_s5 + $0x48] sm:$0xff] (!%p225_p9)  ;;  %v520_v49 = vld [vmem:[%s1834_s5 + $0x50] sm:$0xff] (!%p225_p9)  ;;  %s1493_s18 = smov (!%p225_p9), [#allocation2]  }
  0x12   : > { %1285 = vmatprep.mubr.msk.bf16.mxu1 (!%p225_p9), %vm646_vm1, %v1405_v45  ;;  %v518_v47 = vld [vmem:[%s1834_s5 + $0x40] sm:$0xff] (!%p225_p9)  ;;  %v521_v50 = vld [vmem:[%s1834_s5 + $0x58] sm:$0xff] (!%p225_p9)  ;;  %v523_v52 = vld [vmem:[%s1834_s5 + $0x68] sm:$0xff] (!%p225_p9)  ;;  %s1427_s19 = sshll.u32 (!%p225_p9), %s1493_s18, 4  ;;  %s1428_s19 = int_to_ptr.vmem [resolvable:$false] %s1427_s19 }
  0x13   : > { %319 = vperm.xlu0 (!%p225_p9), %1390, %v1602_v4   ;;  %v522_v51 = vld [vmem:[%s1834_s5 + $0x60] sm:$0xff] (!%p225_p9)  ;;  %v524_v53 = vld [vmem:[%s1834_s5 + $0x70] sm:$0xff] (!%p225_p9)  ;;  %v525_v54 = vld [vmem:[%s1834_s5 + $0x78] sm:$0xff] (!%p225_p9)  ;;  %s1429_s25 = scalar_lea.vmem (!%p225_p9), %s1428_s19, 32 }
  0x14   : > { %329 = vperm.xlu1 (!%p225_p9), %1391, %v1607_v5   ;;  %v1408_v45 = vld [vmem:[%s1831_s2 + $0x18] sm:$0xff] (!%p225_p9)  }
  0x15   : > { %s263_s12 = scalar_select %p262_p10, %s1574_s9, 24 }
  0x17   : > { %s1174_s17 = sshll.u32 %s263_s12, 3  ;;  %334 = vperm.xlu0 %1390, %v1620_v13   ;;  %s1114_s12 = sshll.u32 %s256_s11, 4  ;;  %s1789_s12 = int_to_ptr.vmem [resolvable:$true] %s1114_s12 }
  0x18   : > { %s1597_s20 = scalar_lea.vmem %s1829_s0, %s1174_s17  ;;  %339 = vperm.xlu1 %1391, %v1625_v14   ;;  %s1423_s17 = scalar_lea.vmem %s1789_s12, 16 }
  0x19   : > { %v272_v6 = vld [vmem:[%s1597_s20] sm:$0xff]  ;;  %v273_v7 = vld [vmem:[%s1597_s20 + $0x8] sm:$0xff]  ;;  %v274_v8 = vld [vmem:[%s1597_s20 + $0x10] sm:$0xff]  ;;  %p1424_p11 = scmp.ne.s32.totalorder %s1789_s12, %s1423_s17  ;;  %p1430_p0 = scmp.lt.s32.totalorder %s1789_s12, %s1428_s19 }
  0x1a   : > { %v288_v9 = vpack.c.bf16 %v273_v7, %v272_v6  ;;  %v275_v10 = vld [vmem:[%s1597_s20 + $0x18] sm:$0xff]  ;;  %v276_v15 = vld [vmem:[%s1597_s20 + $0x20] sm:$0xff]  ;;  %v277_v17 = vld [vmem:[%s1597_s20 + $0x28] sm:$0xff]  ;;  %p1431_p1 = scmp.lt.s32.totalorder %s1429_s25, %s1423_s17 }
  0x1b   : > { %v289_v11 = vpack.c.bf16 %v275_v10, %v274_v8  ;;  %v290_v20 = vpack.c.bf16 %v277_v17, %v276_v15  ;;  %344 = vperm.xlu0 %1390, %v1632_v16   ;;  %v278_v21 = vld [vmem:[%s1597_s20 + $0x30] sm:$0xff]  ;;  %v279_v22 = vld [vmem:[%s1597_s20 + $0x38] sm:$0xff]  ;;  %v280_v25 = vld [vmem:[%s1597_s20 + $0x40] sm:$0xff]  ;;  %p1425_p12 = pnand %p1424_p11, %p1564_p5 }
  0x1c   : > { %1337 = vmatprep.subr.msk.bf16.mxu0 %vm372_vm0, %v288_v9  ;;  %v386_v12 = vsel %vm372_vm0, %v288_v9, 0  ;;  %349 = vperm.xlu1 %1391, %v1640_v18   ;;  %v291_v24 = vpack.c.bf16 %v279_v22, %v278_v21  ;;  %v281_v26 = vld [vmem:[%s1597_s20 + $0x48] sm:$0xff]  ;;  %v282_v29 = vld [vmem:[%s1597_s20 + $0x50] sm:$0xff]  ;;  %v283_v30 = vld [vmem:[%s1597_s20 + $0x58] sm:$0xff]  ;;  %p1432_p2 = por %p1431_p1, %p1430_p0 }
  0x1d   : > { %1254 = vmatpush3.bf16.xpose.msra.mxu0 %v386_v12  ;;  %v389_v19 = vsel %vm372_vm0, %v289_v11, 0  ;;  %v392_v23 = vsel %vm372_vm0, %v290_v20, 0  ;;  %v292_v28 = vpack.c.bf16 %v281_v26, %v280_v25  ;;  %v293_v32 = vpack.c.bf16 %v283_v30, %v282_v29  ;;  %v284_v33 = vld [vmem:[%s1597_s20 + $0x60] sm:$0xff]  ;;  %v285_v34 = vld [vmem:[%s1597_s20 + $0x68] sm:$0xff]  ;;  %v286_v37 = vld [vmem:[%s1597_s20 + $0x70] sm:$0xff]  ;;  %p1426_p13 = pneg %p1425_p12 }
  0x1e   : > { %1338 = vmatprep.subr.msk.bf16.mxu0 %vm372_vm0, %v289_v11  ;;  %v395_v27 = vsel %vm372_vm0, %v291_v24, 0  ;;  %v294_v36 = vpack.c.bf16 %v285_v34, %v284_v33  ;;  %v287_v38 = vld [vmem:[%s1597_s20 + $0x78] sm:$0xff] }
  0x1f   : > { %v398_v31 = vsel %vm372_vm0, %v292_v28, 0  ;;  %v401_v35 = vsel %vm372_vm0, %v293_v32, 0  ;;  %v295_v40 = vpack.c.bf16 %v287_v38, %v286_v37  ;;  %1392 = vset.pattern.permute.xlu0 %v1488_v46  ;;  %p1433_p3 = pnand %p1432_p2, %p1426_p13 }
  0x20   : > { %v404_v39 = vsel %vm372_vm0, %v294_v36, 0  ;;  %1393 = vset.pattern.permute.xlu1 %v1488_v46  ;;  %528 = vperm.xlu0 %1392, %v1585_v2   ;;  %v1409_v46 = vld [vmem:[%s1831_s2 + $0x20] sm:$0xff]  }
  0x21   : > { %v407_v41 = vsel %vm372_vm0, %v295_v40, 0  ;;  %533 = vperm.xlu1 %1393, %v1602_v4  }
  0x24   : > { %543 = vperm.xlu0 %1392, %v1607_v5  }
  0x25   : > { %1256 = vmatpush3.bf16.xpose.msra.mxu0 %v389_v19  ;;  %538 = vperm.xlu1 %1393, %v1590_v3  }
  0x26   : > { %1339 = vmatprep.subr.msk.bf16.mxu0 %vm372_vm0, %v290_v20 }
  0x28   : > { %553 = vperm.xlu0 %1392, %v1625_v14  }
  0x29   : > { %548 = vperm.xlu1 %1393, %v1620_v13  }
  0x2c   : > { %563 = vperm.xlu0 %1392, %v1640_v18  }
  0x2d   : > { %1258 = vmatpush3.bf16.xpose.msra.mxu0 %v392_v23  ;;  %558 = vperm.xlu1 %1393, %v1632_v16  }
  0x2e   : > { %1340 = vmatprep.subr.msk.bf16.mxu0 %vm372_vm0, %v291_v24 }
  0x30   : > { %573 = vperm.xlu0 %1392, %v519_v48   ;;  %v1411_v48 = vld [vmem:[%s1831_s2 + $0x30] sm:$0xff]  }
  0x31   : > { %568 = vperm.xlu1 %1393, %v518_v47   ;;  %v1410_v47 = vld [vmem:[%s1831_s2 + $0x28] sm:$0xff]  }
  0x34   : > { %583 = vperm.xlu0 %1392, %v521_v50   ;;  %v1413_v50 = vld [vmem:[%s1832_s3] sm:$0xff]  }
  0x35   : > { %1260 = vmatpush3.bf16.xpose.msra.mxu0 %v395_v27  ;;  %578 = vperm.xlu1 %1393, %v520_v49   ;;  %v1412_v49 = vld [vmem:[%s1831_s2 + $0x38] sm:$0xff]  }
  0x36   : > { %1341 = vmatprep.subr.msk.bf16.mxu0 %vm372_vm0, %v292_v28 }
  0x38   : > { %593 = vperm.xlu0 %1392, %v523_v52  }
  0x39   : > { %588 = vperm.xlu1 %1393, %v522_v51   ;;  %v1489_v51 = vmov 2  }
  0x3c   : > { %603 = vperm.xlu0 %1392, %v525_v54  }
  0x3d   : > { %1262 = vmatpush3.bf16.xpose.msra.mxu0 %v398_v31  ;;  %598 = vperm.xlu1 %1393, %v524_v53  }
  0x3e   : > { %1342 = vmatprep.subr.msk.bf16.mxu0 %vm372_vm0, %v293_v32 }
  0x40   : > { %1395 = vset.pattern.permute.xlu0 %v1489_v51 }
  0x41   : > { %1394 = vset.pattern.permute.xlu1 %v1489_v51  ;;  %821 = vperm.xlu0 %1395, %v1602_v4  }
  0x42   : > { %817 = vperm.xlu1 %1394, %v1585_v2  }
  0x45   : > { %1264 = vmatpush3.bf16.xpose.msra.mxu0 %v401_v35  ;;  %833 = vperm.xlu0 %1395, %v1620_v13  }
  0x46   : > { %1343 = vmatprep.subr.msk.bf16.mxu0 %vm372_vm0, %v294_v36  ;;  %825 = vperm.xlu1 %1394, %v1590_v3  }
  0x49   : > { %841 = vperm.xlu0 %1395, %v1632_v16  }
  0x4a   : > { %829 = vperm.xlu1 %1394, %v1607_v5  }
  0x4d   : > { %1266 = vmatpush3.bf16.xpose.msra.mxu0 %v404_v39 }
  0x4e   : > { %1344 = vmatprep.subr.msk.bf16.mxu0 %vm372_vm0, %v295_v40  ;;  %837 = vperm.xlu1 %1394, %v1625_v14  }
  0x52   : > { %845 = vperm.xlu1 %1394, %v1640_v18  }
  0x55   : > { %1268 = vmatpush3.bf16.xpose.msra.mxu0 %v407_v41 }
  0x5c   : > { %1270 = vmatmul.mubr.msk.bf16.vlgmr.msra.gmra.mrb[0].mxu0 %vm372_vm0, %v1402_v42 }
  0x5d   : > { %1273 = vmatprep.mubr.msk.bf16.mxu0 %vm372_vm0, %v1403_v43  ;;  %v1406_v43 = vld [vmem:[%s1831_s2 + $0x8] sm:$0xff]  }
  0x64   : > { %1274 = vmatmul.mubr.msk.bf16.gmra.mrb[4].mxu0 %vm372_vm0, %v1404_v44  ;;  %v1407_v44 = vld [vmem:[%s1831_s2 + $0x10] sm:$0xff]  }
  0x8e   : > { %v315_v55 = vpop.permute.xlu0 %314 }
  0x8f   : > { %v325_v56 = vpop.permute.xlu1 %324 }
  0x92   : > { %v320_v57 = vpop.permute.xlu0 %319 }
  0x93   : > { %v330_v58 = vpop.permute.xlu1 %329 }
  0x96   : > { %v335_v62 = vpop.permute.xlu0 %334 }
  0x97   : > { %v340_v8 = vpop.permute.xlu1 %339 }
  0x9a   : > { %v345_v19 = vpop.permute.xlu0 %344 }
  0x9b   : > { %v350_v26 = vpop.permute.xlu1 %349 }
  0x9f   : > { %v529_v53 = vpop.permute.xlu0 %528 }
  0xa0   : > { %v534_v52 = vpop.permute.xlu1 %533 }
  0xa4   : > { %v539_v54 = vpop.permute.xlu1 %538 }
 0x12f   : > { %v1271_v59 = vpop.f32.mrb[0].mxu0 }
 0x130   : > { %v452_v60 = vadd.f32 %v1271_v59, %v325_v56  ;;  %v443_v61 = vpop.f32.mrb[1].mxu0  ;;  %v549_v56 = vpop.permute.xlu1 %548 }
 0x131   : > { %v444_v63 = vadd.f32 %v443_v61, %v315_v55  ;;  %v1272_v0 = vpop.f32.mrb[2].mxu0  ;;  %v544_v55 = vpop.permute.xlu0 %543 }
 0x132   : > { %v476_v1 = vmul.f32 0.01, %v452_v60  ;;  %v455_v6 = vadd.f32 %v1272_v0, %v330_v58  ;;  %v446_v7 = vpop.f32.mrb[3].mxu0 }
 0x133   : > { %v474_v9 = vmul.f32 0.01, %v444_v63  ;;  %v447_v10 = vadd.f32 %v446_v7, %v320_v57 }
 0x134   : > { %v477_v11 = vmul.f32 0.01, %v455_v6  ;;  %v484_v15 = vmax.f32 %v452_v60, %v476_v1  ;;  %v559_v58 = vpop.permute.xlu1 %558 }
 0x135   : > { %v475_v12 = vmul.f32 0.01, %v447_v10  ;;  %v482_v20 = vmax.f32 %v444_v63, %v474_v9  ;;  %v554_v57 = vpop.permute.xlu0 %553 }
 0x136   : > { %v485_v17 = vmax.f32 %v455_v6, %v477_v11 }
 0x137   : > { %v483_v21 = vmax.f32 %v447_v10, %v475_v12  ;;  %v1275_v22 = vpop.f32.mrb[4].mxu0 }
 0x138   : > { %v468_v23 = vadd.f32 %v1275_v22, %v345_v19  ;;  %v459_v24 = vpop.f32.mrb[5].mxu0  ;;  %v491_v25 = vpack.c.bf16 %v485_v17, %v484_v15  ;;  %v569_v18 = vpop.permute.xlu1 %568 }
 0x139   : > { %v460_v27 = vadd.f32 %v459_v24, %v335_v62  ;;  %v1276_v28 = vpop.f32.mrb[6].mxu0  ;;  %v490_v29 = vpack.c.bf16 %v483_v21, %v482_v20  ;;  %v564_v62 = vpop.permute.xlu0 %563 }
 0x13a   : > { %v480_v30 = vmul.f32 0.01, %v468_v23  ;;  %v471_v31 = vadd.f32 %v1276_v28, %v350_v26  ;;  %v462_v32 = vpop.f32.mrb[7].mxu0 }
 0x13b   : > { %v478_v33 = vmul.f32 0.01, %v460_v27  ;;  %v463_v34 = vadd.f32 %v462_v32, %v340_v8  ;;  %1277 = vmatprep.subr.bf16.mxu1 %v490_v29 }
 0x13c   : > { %v481_v35 = vmul.f32 0.01, %v471_v31  ;;  %1278 = vmatpush3.bf16.msra.mxu1 %v490_v29  ;;  %v488_v37 = vmax.f32 %v468_v23, %v480_v30  ;;  %v579_v28 = vpop.permute.xlu1 %578 }
 0x13d   : > { %v479_v36 = vmul.f32 0.01, %v463_v34  ;;  %1279 = vmatprep.subr.bf16.mxu1 %v491_v25  ;;  %v486_v39 = vmax.f32 %v460_v27, %v478_v33  ;;  %v574_v11 = vpop.permute.xlu0 %573 }
 0x13e   : > { %v489_v38 = vmax.f32 %v471_v31, %v481_v35 }
 0x13f   : > { %v487_v40 = vmax.f32 %v463_v34, %v479_v36 }
 0x140   : > { %1280 = vmatpush3.bf16.msra.mxu1 %v491_v25  ;;  %v493_v41 = vpack.c.bf16 %v489_v38, %v488_v37 }
 0x141   : > { %v492_v42 = vpack.c.bf16 %v487_v40, %v486_v39  ;;  %v584_v32 = vpop.permute.xlu0 %583 }
 0x143   : > { %1281 = vmatprep.subr.bf16.mxu1 %v492_v42 }
 0x144   : > { %1282 = vmatpush3.bf16.msra.mxu1 %v492_v42  ;;  %v589_v42 = vpop.permute.xlu1 %588 }
 0x145   : > { %1283 = vmatprep.subr.bf16.mxu1 %v493_v41 }
 0x148   : > { %1284 = vmatpush3.bf16.msra.mxu1 %v493_v41 }
 0x14b   : > { %1286 = vmatmul.mubr.msk.bf16.vlgmr.msra.gmra.mrb[0].mxu1 %vm646_vm1, %v1406_v43 }
 0x14c   : > { %1289 = vmatprep.mubr.msk.bf16.mxu1 %vm646_vm1, %v1407_v44 }
 0x153   : > { %1290 = vmatmul.mubr.msk.bf16.gmra.mrb[4].mxu1 %vm646_vm1, %v1408_v45 }
 0x154   : > { %1293 = vmatprep.mubr.msk.bf16.mxu1 %vm646_vm1, %v1409_v46 }
 0x15b   : > { %1294 = vmatmul.mubr.msk.bf16.gmra.mrb[8].mxu1 %vm646_vm1, %v1410_v47 }
 0x15c   : > { %1297 = vmatprep.mubr.msk.bf16.mxu1 %vm646_vm1, %v1411_v48 }
 0x163   : > { %1298 = vmatmul.mubr.msk.bf16.gmra.mrb[12].mxu1 %vm646_vm1, %v1412_v49  ;;  %v594_v49 = vpop.permute.xlu0 %593 }
 0x164   : > { %1317 = vmatprep.mubr.bf16.mxu1 %v1413_v50 }
 0x21e   : > { %v1287_v59 = vpop.f32.mrb[0].mxu1 }
 0x21f   : > { %v714_v60 = vadd.f32 %v1287_v59, %v539_v54  ;;  %v705_v61 = vpop.f32.mrb[1].mxu1 }
 0x220   : > { %v706_v13 = vadd.f32 %v705_v61, %v529_v53  ;;  %v1288_v63 = vpop.f32.mrb[2].mxu1 }
 0x221   : > { %v770_v0 = vmul.f32 0.01, %v714_v60  ;;  %v717_v1 = vadd.f32 %v1288_v63, %v544_v55  ;;  %v708_v16 = vpop.f32.mrb[3].mxu1 }
 0x222   : > { %v768_v6 = vmul.f32 0.01, %v706_v13  ;;  %v709_v14 = vadd.f32 %v708_v16, %v534_v52 }
 0x223   : > { %v771_v7 = vmul.f32 0.01, %v717_v1  ;;  %v786_v9 = vmax.f32 %v714_v60, %v770_v0 }
 0x224   : > { %v769_v8 = vmul.f32 0.01, %v709_v14  ;;  %v784_v12 = vmax.f32 %v706_v13, %v768_v6  ;;  %v604_v13 = vpop.permute.xlu0 %603 }
 0x225   : > { %v787_v10 = vmax.f32 %v717_v1, %v771_v7 }
 0x226   : > { %v785_v15 = vmax.f32 %v709_v14, %v769_v8  ;;  %v1291_v17 = vpop.f32.mrb[4].mxu1 }
 0x227   : > { %v730_v19 = vadd.f32 %v1291_v17, %v559_v58  ;;  %v721_v20 = vpop.f32.mrb[5].mxu1  ;;  %v801_v21 = vpack.c.bf16 %v787_v10, %v786_v9 }
 0x228   : > { %v722_v22 = vadd.f32 %v721_v20, %v549_v56  ;;  %v1292_v23 = vpop.f32.mrb[6].mxu1  ;;  %v800_v24 = vpack.c.bf16 %v785_v15, %v784_v12  ;;  %v599_v56 = vpop.permute.xlu1 %598  ;;  %v1414_v20 = vld [vmem:[%s1832_s3 + $0x8] sm:$0xff]  }
 0x229   : > { %v774_v25 = vmul.f32 0.01, %v730_v19  ;;  %v733_v26 = vadd.f32 %v1292_v23, %v564_v62  ;;  %v724_v27 = vpop.f32.mrb[7].mxu1  ;;  %v1417_v23 = vld [vmem:[%s1833_s4] sm:$0xff]  }
 0x22a   : > { %v772_v29 = vmul.f32 0.01, %v722_v22  ;;  %v725_v30 = vadd.f32 %v724_v27, %v554_v57  ;;  %1301 = vmatprep.subr.bf16.mxu1 %v800_v24  ;;  %v1492_v27 = vmov 5  }
 0x22b   : > { %v775_v31 = vmul.f32 0.01, %v733_v26  ;;  %1302 = vmatpush3.bf16.msra.mxu1 %v800_v24  ;;  %v790_v34 = vmax.f32 %v730_v19, %v774_v25  ;;  %v1490_v24 = vmov 3   ;;  %v1491_v25 = vmov 4  }
 0x22c   : > { %v773_v33 = vmul.f32 0.01, %v725_v30  ;;  %1303 = vmatprep.subr.bf16.mxu1 %v801_v21  ;;  %v788_v36 = vmax.f32 %v722_v22, %v772_v29  ;;  %v1416_v22 = vld [vmem:[%s1832_s3 + $0x18] sm:$0xff]   ;;  %1397 = vset.pattern.permute.xlu1 %v1490_v24 }
 0x22d   : > { %v791_v35 = vmax.f32 %v733_v26, %v775_v31  ;;  %1396 = vset.pattern.permute.xlu0 %v1490_v24  ;;  %972 = vperm.xlu1 %1397, %v1602_v4   ;;  %v1087_v26 = vld [vmem:[%s1834_s5] sm:$0x1] }
 0x22e   : > { %v789_v37 = vmax.f32 %v725_v30, %v773_v33  ;;  %v1295_v38 = vpop.f32.mrb[8].mxu1  ;;  %967 = vperm.xlu0 %1396, %v1585_v2   ;;  %v822_v30 = vpop.permute.xlu0 %821 }
 0x22f   : > { %v746_v39 = vadd.f32 %v1295_v38, %v579_v28  ;;  %v737_v40 = vpop.f32.mrb[9].mxu1  ;;  %1304 = vmatpush3.bf16.msra.mxu1 %v801_v21  ;;  %v803_v41 = vpack.c.bf16 %v791_v35, %v790_v34  ;;  %v1415_v21 = vld [vmem:[%s1832_s3 + $0x10] sm:$0xff]   ;;  %v818_v28 = vpop.permute.xlu1 %817 }
 0x230   : > { %v738_v43 = vadd.f32 %v737_v40, %v569_v18  ;;  %v1296_v44 = vpop.f32.mrb[10].mxu1  ;;  %v802_v45 = vpack.c.bf16 %v789_v37, %v788_v36 }
 0x231   : > { %v778_v46 = vmul.f32 0.01, %v746_v39  ;;  %v749_v47 = vadd.f32 %v1296_v44, %v584_v32  ;;  %v740_v48 = vpop.f32.mrb[11].mxu1  ;;  %977 = vperm.xlu1 %1397, %v1590_v3  }
 0x232   : > { %v776_v50 = vmul.f32 0.01, %v738_v43  ;;  %v741_v51 = vadd.f32 %v740_v48, %v574_v11  ;;  %1305 = vmatprep.subr.bf16.mxu1 %v802_v45  ;;  %982 = vperm.xlu0 %1396, %v1607_v5   ;;  %v834_v34 = vpop.permute.xlu0 %833 }
 0x233   : > { %v779_v52 = vmul.f32 0.01, %v749_v47  ;;  %1306 = vmatpush3.bf16.msra.mxu1 %v802_v45  ;;  %v794_v54 = vmax.f32 %v746_v39, %v778_v46  ;;  %v826_v29 = vpop.permute.xlu1 %825 }
 0x234   : > { %v777_v53 = vmul.f32 0.01, %v741_v51  ;;  %1307 = vmatprep.subr.bf16.mxu1 %v803_v41  ;;  %v792_v57 = vmax.f32 %v738_v43, %v776_v50 }
 0x235   : > { %v795_v55 = vmax.f32 %v749_v47, %v779_v52  ;;  %1398 = vset.pattern.permute.xlu1 %v1491_v25 }
 0x236   : > { %v793_v58 = vmax.f32 %v741_v51, %v777_v53  ;;  %v1299_v59 = vpop.f32.mrb[12].mxu1  ;;  %1399 = vset.pattern.permute.xlu0 %v1491_v25  ;;  %1059 = vperm.xlu1 %1398, %v1585_v2   ;;  %v842_v45 = vpop.permute.xlu0 %841 }
 0x237   : > { %v762_v60 = vadd.f32 %v1299_v59, %v599_v56  ;;  %v753_v61 = vpop.f32.mrb[13].mxu1  ;;  %1308 = vmatpush3.bf16.msra.mxu1 %v803_v41  ;;  %v805_v62 = vpack.c.bf16 %v795_v55, %v794_v54  ;;  %1063 = vperm.xlu0 %1399, %v1602_v4   ;;  %v830_v31 = vpop.permute.xlu1 %829 }
 0x238   : > { %v754_v63 = vadd.f32 %v753_v61, %v589_v42  ;;  %v1300_v0 = vpop.f32.mrb[14].mxu1  ;;  %v804_v1 = vpack.c.bf16 %v793_v58, %v792_v57 }
 0x239   : > { %v782_v16 = vmul.f32 0.01, %v762_v60  ;;  %v765_v6 = vadd.f32 %v1300_v0, %v604_v13  ;;  %v756_v14 = vpop.f32.mrb[15].mxu1 }
 0x23a   : > { %v780_v7 = vmul.f32 0.01, %v754_v63  ;;  %v757_v18 = vadd.f32 %v756_v14, %v594_v49  ;;  %1309 = vmatprep.subr.bf16.mxu1 %v804_v1  ;;  %1067 = vperm.xlu1 %1398, %v1590_v3  }
 0x23b   : > { %v783_v8 = vmul.f32 0.01, %v765_v6  ;;  %1310 = vmatpush3.bf16.msra.mxu1 %v804_v1  ;;  %v798_v10 = vmax.f32 %v762_v60, %v782_v16  ;;  %1400 = vset.pattern.permute.xlu0 %v1492_v27  ;;  %v838_v39 = vpop.permute.xlu1 %837 }
 0x23c   : > { %v781_v9 = vmul.f32 0.01, %v757_v18  ;;  %1311 = vmatprep.subr.bf16.mxu1 %v805_v62  ;;  %v796_v12 = vmax.f32 %v754_v63, %v780_v7  ;;  %1090 = vperm.xlu0 %1400, %v1087_v26  }
 0x23d   : > { %v799_v11 = vmax.f32 %v765_v6, %v783_v8  ;;  %v1418_v6 = vld [vmem:[%s1833_s4 + $0x8] sm:$0xff]  }
 0x23e   : > { %v797_v15 = vmax.f32 %v757_v18, %v781_v9  ;;  %1071 = vperm.xlu1 %1398, %v1607_v5  }
 0x23f   : > { %1312 = vmatpush3.bf16.msra.mxu1 %v805_v62  ;;  %v807_v17 = vpack.c.bf16 %v799_v11, %v798_v10  ;;  %v846_v51 = vpop.permute.xlu1 %845 }
 0x240   : > { %v806_v19 = vpack.c.bf16 %v797_v15, %v796_v12 }
 0x242   : > { %1313 = vmatprep.subr.bf16.mxu1 %v806_v19 }
 0x243   : > { %1314 = vmatpush3.bf16.msra.mxu1 %v806_v19 }
 0x244   : > { %1315 = vmatprep.subr.bf16.mxu1 %v807_v17 }
 0x247   : > { %1316 = vmatpush3.bf16.msra.mxu1 %v807_v17 }
 0x24a   : > { %1318 = vmatmul.mubr.bf16.vlgmr.msra.gmra.mrb[16].mxu1 %v1414_v20 }
 0x24b   : > { %1321 = vmatprep.mubr.bf16.mxu1 %v1415_v21 }
 0x252   : > { %1322 = vmatmul.mubr.bf16.gmra.mrb[20].mxu1 %v1416_v22 }
 0x253   : > { %1333 = vmatprep.mubr.msk.bf16.mxu1 %vm646_vm1, %v1417_v23 }
 0x2ac   : > { %v973_v14 = vpop.permute.xlu1 %972 }
 0x2ad   : > { %v968_v18 = vpop.permute.xlu0 %967 }
 0x2b0   : > { %v978_v7 = vpop.permute.xlu1 %977 }
 0x2b1   : > { %v983_v12 = vpop.permute.xlu0 %982 }
 0x2b5   : > { %v1060_v9 = vpop.permute.xlu1 %1059 }
 0x2b9   : > { %v1068_v27 = vpop.permute.xlu1 %1067 }
 0x31d   : > { %v1319_v32 = vpop.f32.mrb[16].mxu1 }
 0x31e   : > { %v915_v33 = vadd.f32 %v1319_v32, %v826_v29  ;;  %v906_v2 = vpop.f32.mrb[17].mxu1 }
 0x31f   : > { %v907_v4 = vadd.f32 %v906_v2, %v818_v28  ;;  %v1320_v35 = vpop.f32.mrb[18].mxu1  ;;  %v1064_v28 = vpop.permute.xlu0 %1063 }
 0x320   : > { %v939_v36 = vmul.f32 0.01, %v915_v33  ;;  %v918_v37 = vadd.f32 %v1320_v35, %v830_v31  ;;  %v909_v38 = vpop.f32.mrb[19].mxu1 }
 0x321   : > { %v937_v3 = vmul.f32 0.01, %v907_v4  ;;  %v910_v40 = vadd.f32 %v909_v38, %v822_v30 }
 0x322   : > { %v940_v41 = vmul.f32 0.01, %v918_v37  ;;  %v947_v43 = vmax.f32 %v915_v33, %v939_v36 }
 0x323   : > { %v938_v42 = vmul.f32 0.01, %v910_v40  ;;  %v945_v44 = vmax.f32 %v907_v4, %v937_v3  ;;  %v1072_v4 = vpop.permute.xlu1 %1071 }
 0x324   : > { %v948_v5 = vmax.f32 %v918_v37, %v940_v41 }
 0x325   : > { %v946_v46 = vmax.f32 %v910_v40, %v938_v42  ;;  %v1323_v47 = vpop.f32.mrb[20].mxu1  ;;  %v1091_v42 = vpop.permute.xlu0 %1090 }
 0x326   : > { %v931_v48 = vadd.f32 %v1323_v47, %v842_v45  ;;  %v922_v49 = vpop.f32.mrb[21].mxu1  ;;  %v954_v50 = vpack.c.bf16 %v948_v5, %v947_v43 }
 0x327   : > { %v923_v52 = vadd.f32 %v922_v49, %v834_v34  ;;  %v1324_v53 = vpop.f32.mrb[22].mxu1  ;;  %v953_v54 = vpack.c.bf16 %v946_v46, %v945_v44 }
 0x328   : > { %v943_v55 = vmul.f32 0.01, %v931_v48  ;;  %v934_v56 = vadd.f32 %v1324_v53, %v846_v51  ;;  %v925_v57 = vpop.f32.mrb[23].mxu1 }
 0x329   : > { %v941_v58 = vmul.f32 0.01, %v923_v52  ;;  %v926_v59 = vadd.f32 %v925_v57, %v838_v39  ;;  %1325 = vmatprep.subr.bf16.mxu1 %v953_v54 }
 0x32a   : > { %v944_v60 = vmul.f32 0.01, %v934_v56  ;;  %1326 = vmatpush3.bf16.msra.mxu1 %v953_v54  ;;  %v951_v62 = vmax.f32 %v931_v48, %v943_v55 }
 0x32b   : > { %v942_v61 = vmul.f32 0.01, %v926_v59  ;;  %1327 = vmatprep.subr.bf16.mxu1 %v954_v50  ;;  %v949_v63 = vmax.f32 %v923_v52, %v941_v58 }
 0x32c   : > { %v952_v13 = vmax.f32 %v934_v56, %v944_v60 }
 0x32d   : > { %v950_v0 = vmax.f32 %v926_v59, %v942_v61 }
 0x32e   : > { %1328 = vmatpush3.bf16.msra.mxu1 %v954_v50  ;;  %v956_v1 = vpack.c.bf16 %v952_v13, %v951_v62 }
 0x32f   : > { %v955_v16 = vpack.c.bf16 %v950_v0, %v949_v63 }
 0x331   : > { %1329 = vmatprep.subr.bf16.mxu1 %v955_v16 }
 0x332   : > { %1330 = vmatpush3.bf16.msra.mxu1 %v955_v16 }
 0x333   : > { %1331 = vmatprep.subr.bf16.mxu1 %v956_v1 }
 0x336   : > { %1332 = vmatpush3.bf16.msra.mxu1 %v956_v1 }
 0x339   : > { %1334 = vmatmul.mubr.msk.bf16.vlgmr.msra.gmra.mrb[24].mxu1 %vm646_vm1, %v1418_v6 }
 0x40c   : > { %v1335_v8 = vpop.f32.mrb[24].mxu1 }
 0x40d   : > { %v1044_v10 = vadd.f32 %v1335_v8, %v978_v7  ;;  %v1035_v11 = vpop.f32.mrb[25].mxu1 }
 0x40e   : > { %v1036_v15 = vadd.f32 %v1035_v11, %v968_v18  ;;  %v1336_v17 = vpop.f32.mrb[26].mxu1 }
 0x40f   : > { %v1047_v19 = vadd.f32 %v1336_v17, %v983_v12  ;;  %v1038_v20 = vpop.f32.mrb[27].mxu1  ;;  %v1052_v21 = vmul.f32 0.01, %v1044_v10 }
 0x410   : > { %v1050_v22 = vmul.f32 0.01, %v1036_v15  ;;  %v1039_v23 = vadd.f32 %v1038_v20, %v973_v14 }
 0x411   : > { %v1053_v25 = vmul.f32 0.01, %v1047_v19  ;;  %v1056_v29 = vmax.f32 %v1044_v10, %v1052_v21 }
 0x412   : > { %v1054_v24 = vmax.f32 %v1036_v15, %v1050_v22  ;;  %v1051_v26 = vmul.f32 0.01, %v1039_v23 }
 0x413   : > { %v1057_v31 = vmax.f32 %v1047_v19, %v1053_v25  ;;  %v1076_v2 = vmul.f32 %v1068_v27, %v1056_v29 }
 0x414   : > { %v1055_v30 = vmax.f32 %v1039_v23, %v1051_v26  ;;  %v1074_v32 = vmul.f32 %v1060_v9, %v1054_v24 }
 0x415   : > { %v1077_v35 = vmul.f32 %v1072_v4, %v1057_v31 }
 0x416   : > { %v1075_v33 = vmul.f32 %v1064_v28, %v1055_v30 }
 0x418   : > { %v1078_v34 = vadd.f32 %v1075_v33, %v1074_v32 }
 0x41a   : > { %v1079_v36 = vadd.f32 %v1078_v34, %v1076_v2 }
 0x41c   : > { %v1080_v37 = vadd.f32 %v1079_v36, %v1077_v35 }
 0x41e   : > { %v1081_v38 = vrot.slane %v1080_v37, 4 }
 0x420   : > { %v1082_v39 = vadd.f32 %v1081_v38, %v1080_v37 }
 0x422   : > { %v1083_v3 = vrot.slane %v1082_v39, 2 }
 0x424   : > { %v1084_v40 = vadd.f32 %v1083_v3, %v1082_v39 }
 0x426   : > { %v1085_v41 = vrot.slane %v1084_v40, 1 }
 0x428   : > { %v1086_v43 = vadd.f32 %v1085_v41, %v1084_v40 }
 0x42a   : > { %v1093_v5 = vadd.f32 %v1091_v42, %v1086_v43 }
 0x42c   : > { %v1207_v44 = vmul.f32 -1.442695, %v1093_v5 }
 0x42e   : > { %1419 = vpow2.f32 %v1207_v44 }
 0x438   : > { %v1420_v45 = vpop.eup %1419 }
 0x439   : > { %v1097_v46 = vadd.f32 1.0, %v1420_v45 }
 0x43b   : > { %1421 = vrcp.f32 %v1097_v46 }
 0x445   : > { %v1422_v47 = vpop.eup %1421 }
 0x446   : > { %1100 = vst [vmem:[%s256_s11] sm:$0x1] %v1422_v47 }
 0x447   : > { %1436 = shalt.err (!%p1433_p3)
}
 0x448   : > { %s1437_s9 = scalar_lea.hbm %s1787_s15, 16  ;;  %s1441_s28 = scalar_lea.hbm %s1835_s6, 32 }
 0x449   : > { %p1438_p4 = scmp.ne.s32.totalorder %s1787_s15, %s1437_s9  ;;  %p1442_p9 = scmp.lt.u32.totalorder %s1787_s15, %s1835_s6 }
 0x44a   : > { %p1443_p10 = scmp.lt.u32.totalorder %s1441_s28, %s1437_s9  ;;  %p1445_p12 = scmp.lt.u32.totalorder %s1437_s9, %s1787_s15 }
 0x44b   : > { %p1439_p7 = pnand %p1438_p4, %p1564_p5 }
 0x44c   : > { %p1444_p11 = por %p1443_p10, %p1442_p9 }
 0x44d   : > { %p1440_p8 = pneg %p1439_p7 }
 0x44e   : > { %p1446_p13 = por %p1445_p12, %p1444_p11 }
 0x450   : > { %p1447_p0 = pnand %p1446_p13, %p1440_p8 }
 0x452   : > { %1450 = shalt.err (!%p1447_p0)
}
 0x453   : > { %1345 = dma.vmem_to_hbm [thread:$0]  (%p1564_p5), %s1789_s12, 16, %s1787_s15, %s1102_s16  }
 0x454 PF: > { %p1351_p1 = scmp.ge.s32.totalorder %s1485_s24, 2  ;;  %s1126_s11 = sand.u32 1, %s1473_s21  }
 0x455   : > { %s1127_s13 = scalar_lea.sflag [#allocation3], %s1126_s11 }
 0x456   : > { %p1348_p2 = pnand %p1351_p1, %p1568_p6 }
 0x458   : > { %1468 = dma.done.wait (!%p1348_p2), %s1127_s13, 16  }
 0x459   : > { %1470 = vsyncadd (!%p1348_p2), %s1127_s13, 4294967280  ;;  %p16_p3 = scmp.ge.s32.totalorder %s1552_s27, 4   ;;  %s1838_s21 = smov %s1477_s22 }
 0x45a   : > { %s1839_s22 = smov %s1481_s23  ;;  %s1840_s23 = smov %s1562_s30 }
 0x45b   : > { %s1841_s24 = smov %s1552_s27  ;;  %18 = sbr.rel (!%p16_p3) target bundleno = 3 (0x3), region = 79 }
 0x462   :  { %1131 = vsyncpa [#allocation3], 1 }
 0x463   :  { %1133 = vsyncpa [#allocation3 + $0x1], 1 }

</bundles_post_ra>
